<compile_context>
chip_gen: v7x
topology: tpu7x:2x2x1
jax: 0.10.0
libtpu: 0.0.40
codegen_flags: <defaults>
</compile_context>

<pallas_src>
import functools

import jax
import jax.numpy as jnp
from jax.experimental import pallas as pl
from jax.experimental.pallas import tpu as pltpu


def memory_kernel(obs_ref, aux_ref, h_ref,
                  w_enc_ref, b_enc_ref, ln_w_ref, ln_b_ref,
                  w_ih_enc_ref, w_ih_aux_ref, b_ih_ref,
                  w_hh_ref, b_hh_ref,
                  out_ref):
    H = h_ref.shape[-1]

    # ---- obs encoder: Linear -> LayerNorm -> ReLU -------------------------
    obs = obs_ref[...]
    y = jnp.dot(obs, w_enc_ref[...], preferred_element_type=jnp.float32)
    y = y + b_enc_ref[...]                              # (B, H)
    # single-pass statistics: var = E[y^2] - E[y]^2
    mean = jnp.mean(y, axis=-1, keepdims=True)
    mean_sq = jnp.mean(y * y, axis=-1, keepdims=True)
    var = mean_sq - mean * mean
    y = (y - mean) * jax.lax.rsqrt(var + 1e-5)
    y = y * ln_w_ref[...] + ln_b_ref[...]
    enc = jnp.maximum(y, 0.0)                           # (B, H)

    # ---- GRU single step ---------------------------------------------------
    h = h_ref[...]                                      # (B, H)
    aux = aux_ref[...]                                  # (B, S+1) = [skill, rew]

    # gi = x @ W_ih^T + b_ih with x = [enc, skill, rew]; the concat is folded
    # into two per-block matmuls (enc-block and fused aux-block).
    gi = jnp.dot(enc, w_ih_enc_ref[...], preferred_element_type=jnp.float32)
    gi = gi + jnp.dot(aux, w_ih_aux_ref[...],
                      preferred_element_type=jnp.float32)
    gi = gi + b_ih_ref[...]                             # (B, 3H)

    gh = jnp.dot(h, w_hh_ref[...], preferred_element_type=jnp.float32)
    gh = gh + b_hh_ref[...]                             # (B, 3H)

    r = jax.nn.sigmoid(gi[:, 0:H] + gh[:, 0:H])
    z = jax.nn.sigmoid(gi[:, H:2 * H] + gh[:, H:2 * H])
    n = jnp.tanh(gi[:, 2 * H:3 * H] + r * gh[:, 2 * H:3 * H])
    h_new = (1.0 - z) * n + z * h

    out_ref[...] = h_new


@jax.jit
def memory_forward(obs, prev_skill, prev_rew, hidden, params):
    """Inference-mode forward of Memory (training=False, 2-D inputs).

    obs:        (B, obs_dim)   f32
    prev_skill: (B, skill_dim) f32
    prev_rew:   (B, 1)         f32
    hidden:     (1, B, H)      f32  (PyTorch GRU hidden layout)
    returns (gru_out (B, H), hidden_out (1, B, H))
    """
    B, _ = obs.shape
    H = params["w_enc_t"].shape[1]
    h0 = hidden[0]                                      # (B, H)
    aux = jnp.concatenate([prev_skill, prev_rew], axis=-1)   # (B, S+1)

    vmem_spec = pl.BlockSpec(memory_space=pltpu.VMEM)
    num_inputs = 12

    out = pl.pallas_call(
        memory_kernel,
        out_shape=jax.ShapeDtypeStruct((B, H), jnp.float32),
        in_specs=[vmem_spec] * num_inputs,
        out_specs=vmem_spec,
    )(obs, aux, h0,
      params["w_enc_t"], params["b_enc"], params["ln_w"], params["ln_b"],
      params["w_ih_enc_t"], params["w_ih_aux_t"], params["b_ih"],
      params["w_hh_t"], params["b_hh"])

    return out, out[None]                               # hidden_out: (1, B, H)


def init_params(key, obs_dim, skill_dim, hidden_size):
    """Deterministic synthetic parameters (same shapes as the nn.Module)."""
    H = hidden_size
    in_sz = H + skill_dim + 1
    ks = jax.random.split(key, 8)
    scale = 0.1

    w_enc = scale * jax.random.normal(ks[0], (H, obs_dim), jnp.float32)   # Linear.weight
    b_enc = scale * jax.random.normal(ks[1], (H,), jnp.float32)
    ln_w = jnp.ones((H,), jnp.float32)
    ln_b = jnp.zeros((H,), jnp.float32)
    w_ih = scale * jax.random.normal(ks[2], (3 * H, in_sz), jnp.float32)  # GRU weight_ih_l0
    w_hh = scale * jax.random.normal(ks[3], (3 * H, H), jnp.float32)      # GRU weight_hh_l0
    b_ih = scale * jax.random.normal(ks[4], (3 * H,), jnp.float32)
    b_hh = scale * jax.random.normal(ks[5], (3 * H,), jnp.float32)

    # Pre-transpose / split so the kernel does plain (B,K)@(K,N) matmuls and
    # never has to concat [enc, skill, rew] in VMEM.  The skill and reward
    # column blocks of W_ih are fused into one aux weight.
    return {
        "w_enc_t": w_enc.T,                                   # (obs_dim, H)
        "b_enc": b_enc[None, :],                              # (1, H)
        "ln_w": ln_w[None, :],                                # (1, H)
        "ln_b": ln_b[None, :],                                # (1, H)
        "w_ih_enc_t": w_ih[:, :H].T,                          # (H, 3H)
        "w_ih_aux_t": w_ih[:, H:].T,                          # (skill_dim+1, 3H)
        "b_ih": b_ih[None, :],                                # (1, 3H)
        "w_hh_t": w_hh.T,                                     # (H, 3H)
        "b_hh": b_hh[None, :],                                # (1, 3H)
    }


def memory_forward_ref(obs, prev_skill, prev_rew, hidden, params):
    """Pure-JAX reference (mirrors PyTorch semantics) for validation."""
    H = params["w_enc_t"].shape[1]
    y = obs @ params["w_enc_t"] + params["b_enc"]
    mean = y.mean(-1, keepdims=True)
    var = ((y - mean) ** 2).mean(-1, keepdims=True)
    y = (y - mean) / jnp.sqrt(var + 1e-5) * params["ln_w"] + params["ln_b"]
    enc = jnp.maximum(y, 0.0)
    h = hidden[0]
    aux = jnp.concatenate([prev_skill, prev_rew], axis=-1)
    gi = enc @ params["w_ih_enc_t"] + aux @ params["w_ih_aux_t"] + params["b_ih"]
    gh = h @ params["w_hh_t"] + params["b_hh"]
    r = jax.nn.sigmoid(gi[:, :H] + gh[:, :H])
    z = jax.nn.sigmoid(gi[:, H:2 * H] + gh[:, H:2 * H])
    n = jnp.tanh(gi[:, 2 * H:] + r * gh[:, 2 * H:])
    h_new = (1.0 - z) * n + z * h
    return h_new, h_new[None]


if __name__ == "__main__":
    B, obs_dim, skill_dim, hidden_size = 8, 24, 8, 32

    key = jax.random.PRNGKey(0)
    k_p, k_o, k_s, k_r, k_h = jax.random.split(key, 5)

    params = init_params(k_p, obs_dim, skill_dim, hidden_size)
    obs = jax.random.normal(k_o, (B, obs_dim), jnp.float32)
    prev_skill = jax.nn.one_hot(
        jax.random.randint(k_s, (B,), 0, skill_dim), skill_dim, dtype=jnp.float32)
    prev_rew = jax.random.normal(k_r, (B, 1), jnp.float32)
    hidden = jax.random.normal(k_h, (1, B, hidden_size), jnp.float32)

    gru_out, hidden_out = memory_forward(obs, prev_skill, prev_rew, hidden, params)
    jax.block_until_ready((gru_out, hidden_out))

    ref_out, ref_hidden = memory_forward_ref(obs, prev_skill, prev_rew, hidden, params)
    assert gru_out.shape == (B, hidden_size)
    assert hidden_out.shape == (1, B, hidden_size)
    assert jnp.allclose(gru_out, ref_out, atol=1e-5, rtol=1e-5)
    assert jnp.allclose(hidden_out, ref_hidden, atol=1e-5, rtol=1e-5)

    print("KERNEL_OK")
</pallas_src>

<mosaic_0001>
module attributes {stable_mosaic.version = 11 : i64} {
  func.func @memory_kernel(%arg0: memref<8x24xf32, #tpu.memory_space<vmem>>, %arg1: memref<8x9xf32, #tpu.memory_space<vmem>>, %arg2: memref<8x32xf32, #tpu.memory_space<vmem>>, %arg3: memref<24x32xf32, #tpu.memory_space<vmem>>, %arg4: memref<1x32xf32, #tpu.memory_space<vmem>>, %arg5: memref<1x32xf32, #tpu.memory_space<vmem>>, %arg6: memref<1x32xf32, #tpu.memory_space<vmem>>, %arg7: memref<32x96xf32, #tpu.memory_space<vmem>>, %arg8: memref<9x96xf32, #tpu.memory_space<vmem>>, %arg9: memref<1x96xf32, #tpu.memory_space<vmem>>, %arg10: memref<32x96xf32, #tpu.memory_space<vmem>>, %arg11: memref<1x96xf32, #tpu.memory_space<vmem>>, %arg12: memref<8x32xf32, #tpu.memory_space<vmem>>) attributes {dimension_semantics = [], scalar_prefetch = 0 : i64, scratch_operands = 0 : i64, tpu.core_type = #tpu.core_type<tc>} {
    %c0 = arith.constant 0 : index
    %c0_0 = arith.constant 0 : index
    %0 = vector.load %arg0[%c0, %c0_0] : memref<8x24xf32, #tpu.memory_space<vmem>>, vector<8x24xf32>
    %c0_1 = arith.constant 0 : index
    %c0_2 = arith.constant 0 : index
    %1 = vector.load %arg3[%c0_1, %c0_2] : memref<24x32xf32, #tpu.memory_space<vmem>>, vector<24x32xf32>
    %cst = arith.constant dense<0.000000e+00> : vector<8x32xf32>
    %2 = tpu.matmul %0, %1, %cst {dimension_numbers = #tpu.dot_dimension_numbers<[1], [0], [0], [1], [0, 0, 1, 1], [], []>} : vector<8x24xf32>, vector<24x32xf32>, vector<8x32xf32> -> vector<8x32xf32>
    %c0_3 = arith.constant 0 : index
    %c0_4 = arith.constant 0 : index
    %3 = vector.load %arg4[%c0_3, %c0_4] : memref<1x32xf32, #tpu.memory_space<vmem>>, vector<1x32xf32>
    %4 = vector.broadcast %3 : vector<1x32xf32> to vector<8x32xf32>
    %5 = arith.addf %2, %4 : vector<8x32xf32>
    %cst_5 = arith.constant dense<0.000000e+00> : vector<8xf32>
    %6 = vector.multi_reduction <add>, %5, %cst_5 [1] : vector<8x32xf32> to vector<8xf32>
    %7 = vector.shape_cast %6 : vector<8xf32> to vector<8x1xf32>
    %cst_6 = arith.constant 3.200000e+01 : f32
    %8 = vector.broadcast %cst_6 : f32 to vector<8x1xf32>
    %9 = arith.divf %7, %8 : vector<8x1xf32>
    %10 = arith.mulf %5, %5 : vector<8x32xf32>
    %cst_7 = arith.constant dense<0.000000e+00> : vector<8xf32>
    %11 = vector.multi_reduction <add>, %10, %cst_7 [1] : vector<8x32xf32> to vector<8xf32>
    %12 = vector.shape_cast %11 : vector<8xf32> to vector<8x1xf32>
    %cst_8 = arith.constant 3.200000e+01 : f32
    %13 = vector.broadcast %cst_8 : f32 to vector<8x1xf32>
    %14 = arith.divf %12, %13 : vector<8x1xf32>
    %15 = arith.mulf %9, %9 : vector<8x1xf32>
    %16 = arith.subf %14, %15 : vector<8x1xf32>
    %17 = vector.broadcast %9 : vector<8x1xf32> to vector<8x32xf32>
    %18 = arith.subf %5, %17 : vector<8x32xf32>
    %cst_9 = arith.constant 9.99999974E-6 : f32
    %19 = vector.broadcast %cst_9 : f32 to vector<8x1xf32>
    %20 = arith.addf %16, %19 : vector<8x1xf32>
    %21 = math.rsqrt %20 : vector<8x1xf32>
    %22 = vector.broadcast %21 : vector<8x1xf32> to vector<8x32xf32>
    %23 = arith.mulf %18, %22 : vector<8x32xf32>
    %c0_10 = arith.constant 0 : index
    %c0_11 = arith.constant 0 : index
    %24 = vector.load %arg5[%c0_10, %c0_11] : memref<1x32xf32, #tpu.memory_space<vmem>>, vector<1x32xf32>
    %25 = vector.broadcast %24 : vector<1x32xf32> to vector<8x32xf32>
    %26 = arith.mulf %23, %25 : vector<8x32xf32>
    %c0_12 = arith.constant 0 : index
    %c0_13 = arith.constant 0 : index
    %27 = vector.load %arg6[%c0_12, %c0_13] : memref<1x32xf32, #tpu.memory_space<vmem>>, vector<1x32xf32>
    %28 = vector.broadcast %27 : vector<1x32xf32> to vector<8x32xf32>
    %29 = arith.addf %26, %28 : vector<8x32xf32>
    %cst_14 = arith.constant 0.000000e+00 : f32
    %30 = vector.broadcast %cst_14 : f32 to vector<8x32xf32>
    %31 = arith.maximumf %29, %30 : vector<8x32xf32>
    %c0_15 = arith.constant 0 : index
    %c0_16 = arith.constant 0 : index
    %32 = vector.load %arg2[%c0_15, %c0_16] : memref<8x32xf32, #tpu.memory_space<vmem>>, vector<8x32xf32>
    %c0_17 = arith.constant 0 : index
    %c0_18 = arith.constant 0 : index
    %33 = vector.load %arg1[%c0_17, %c0_18] : memref<8x9xf32, #tpu.memory_space<vmem>>, vector<8x9xf32>
    %c0_19 = arith.constant 0 : index
    %c0_20 = arith.constant 0 : index
    %34 = vector.load %arg7[%c0_19, %c0_20] : memref<32x96xf32, #tpu.memory_space<vmem>>, vector<32x96xf32>
    %cst_21 = arith.constant dense<0.000000e+00> : vector<8x96xf32>
    %35 = tpu.matmul %31, %34, %cst_21 {dimension_numbers = #tpu.dot_dimension_numbers<[1], [0], [0], [1], [0, 0, 1, 1], [], []>} : vector<8x32xf32>, vector<32x96xf32>, vector<8x96xf32> -> vector<8x96xf32>
    %c0_22 = arith.constant 0 : index
    %c0_23 = arith.constant 0 : index
    %36 = vector.load %arg8[%c0_22, %c0_23] : memref<9x96xf32, #tpu.memory_space<vmem>>, vector<9x96xf32>
    %cst_24 = arith.constant dense<0.000000e+00> : vector<8x96xf32>
    %37 = tpu.matmul %33, %36, %cst_24 {dimension_numbers = #tpu.dot_dimension_numbers<[1], [0], [0], [1], [0, 0, 1, 1], [], []>} : vector<8x9xf32>, vector<9x96xf32>, vector<8x96xf32> -> vector<8x96xf32>
    %38 = arith.addf %35, %37 : vector<8x96xf32>
    %c0_25 = arith.constant 0 : index
    %c0_26 = arith.constant 0 : index
    %39 = vector.load %arg9[%c0_25, %c0_26] : memref<1x96xf32, #tpu.memory_space<vmem>>, vector<1x96xf32>
    %40 = vector.broadcast %39 : vector<1x96xf32> to vector<8x96xf32>
    %41 = arith.addf %38, %40 : vector<8x96xf32>
    %c0_27 = arith.constant 0 : index
    %c0_28 = arith.constant 0 : index
    %42 = vector.load %arg10[%c0_27, %c0_28] : memref<32x96xf32, #tpu.memory_space<vmem>>, vector<32x96xf32>
    %cst_29 = arith.constant dense<0.000000e+00> : vector<8x96xf32>
    %43 = tpu.matmul %32, %42, %cst_29 {dimension_numbers = #tpu.dot_dimension_numbers<[1], [0], [0], [1], [0, 0, 1, 1], [], []>} : vector<8x32xf32>, vector<32x96xf32>, vector<8x96xf32> -> vector<8x96xf32>
    %c0_30 = arith.constant 0 : index
    %c0_31 = arith.constant 0 : index
    %44 = vector.load %arg11[%c0_30, %c0_31] : memref<1x96xf32, #tpu.memory_space<vmem>>, vector<1x96xf32>
    %45 = vector.broadcast %44 : vector<1x96xf32> to vector<8x96xf32>
    %46 = arith.addf %43, %45 : vector<8x96xf32>
    %47 = vector.extract_strided_slice %41 {offsets = [0, 0], sizes = [8, 32], strides = [1, 1]} : vector<8x96xf32> to vector<8x32xf32>
    %48 = vector.extract_strided_slice %46 {offsets = [0, 0], sizes = [8, 32], strides = [1, 1]} : vector<8x96xf32> to vector<8x32xf32>
    %49 = arith.addf %47, %48 : vector<8x32xf32>
    %50 = arith.negf %49 : vector<8x32xf32>
    %51 = math.exp %50 : vector<8x32xf32>
    %cst_32 = arith.constant 1.000000e+00 : f32
    %52 = vector.broadcast %cst_32 : f32 to vector<8x32xf32>
    %53 = arith.addf %52, %51 : vector<8x32xf32>
    %54 = arith.divf %52, %53 : vector<8x32xf32>
    %55 = vector.extract_strided_slice %41 {offsets = [0, 32], sizes = [8, 32], strides = [1, 1]} : vector<8x96xf32> to vector<8x32xf32>
    %56 = vector.extract_strided_slice %46 {offsets = [0, 32], sizes = [8, 32], strides = [1, 1]} : vector<8x96xf32> to vector<8x32xf32>
    %57 = arith.addf %55, %56 : vector<8x32xf32>
    %58 = arith.negf %57 : vector<8x32xf32>
    %59 = math.exp %58 : vector<8x32xf32>
    %cst_33 = arith.constant 1.000000e+00 : f32
    %60 = vector.broadcast %cst_33 : f32 to vector<8x32xf32>
    %61 = arith.addf %60, %59 : vector<8x32xf32>
    %62 = arith.divf %60, %61 : vector<8x32xf32>
    %63 = vector.extract_strided_slice %41 {offsets = [0, 64], sizes = [8, 32], strides = [1, 1]} : vector<8x96xf32> to vector<8x32xf32>
    %64 = vector.extract_strided_slice %46 {offsets = [0, 64], sizes = [8, 32], strides = [1, 1]} : vector<8x96xf32> to vector<8x32xf32>
    %65 = arith.mulf %54, %64 : vector<8x32xf32>
    %66 = arith.addf %63, %65 : vector<8x32xf32>
    %67 = math.tanh %66 : vector<8x32xf32>
    %cst_34 = arith.constant 1.000000e+00 : f32
    %68 = vector.broadcast %cst_34 : f32 to vector<8x32xf32>
    %69 = arith.subf %68, %62 : vector<8x32xf32>
    %70 = arith.mulf %69, %67 : vector<8x32xf32>
    %71 = arith.mulf %62, %32 : vector<8x32xf32>
    %72 = arith.addf %70, %71 : vector<8x32xf32>
    %c0_35 = arith.constant 0 : index
    %c0_36 = arith.constant 0 : index
    %73 = vector.load %arg12[%c0_35, %c0_36] : memref<8x32xf32, #tpu.memory_space<vmem>>, vector<8x32xf32>
    tpu.vector_store %arg12[%c0_35, %c0_36], %72 {strides = array<i32>} : memref<8x32xf32, #tpu.memory_space<vmem>>, vector<8x32xf32>,
    return
  }
}

</mosaic_0001>

<bundles_post_ra>
// kernel: memory_forward.1
= control target key start
LH: loop header
LB: loop body
LE: loop exit
PB: predicated region body
PF: predicated region fallthrough
CT: control target
= control target key end

     0   :  { %17 = vsyncpa [#allocation3], 0  ;;  %s987_s0 = inlined_call_operand.hbm [shape: f32[8,24], index: 0, kind: input, shape index: {}]   ;;  %s988_s1 = inlined_call_operand.vmem [shape: f32[8,9], index: 1, kind: input, shape index: {}]   ;;  %s989_s2 = inlined_call_operand.hbm [shape: f32[8,32], index: 2, kind: input, shape index: {}]   ;;  %s990_s3 = inlined_call_operand.hbm [shape: f32[24,32], index: 3, kind: input, shape index: {}]   ;;  %s991_s4 = inlined_call_operand.vmem [shape: f32[1,32], index: 4, kind: input, shape index: {}]   ;;  %s992_s5 = inlined_call_operand.vmem [shape: f32[1,32], index: 5, kind: input, shape index: {}]   ;;  %s993_s6 = inlined_call_operand.vmem [shape: f32[1,32], index: 6, kind: input, shape index: {}]   ;;  %s994_s7 = inlined_call_operand.vmem [shape: f32[32,96], index: 7, kind: input, shape index: {}]   ;;  %s995_s8 = inlined_call_operand.hbm [shape: f32[9,96], index: 8, kind: input, shape index: {}]   ;;  %s996_s9 = inlined_call_operand.hbm [shape: f32[1,96], index: 9, kind: input, shape index: {}]   ;;  %s997_s10 = inlined_call_operand.vmem [shape: f32[32,96], index: 10, kind: input, shape index: {}]   ;;  %s998_s11 = inlined_call_operand.hbm [shape: f32[1,96], index: 11, kind: input, shape index: {}]   ;;  %s999_s12 = inlined_call_operand.vmem [shape: f32[8,32], index: 12, kind: output, shape index: {}]  }
   0x1   :  { %18 = vsyncpa [#allocation5], 0 }
   0x2   :  { %19 = vsyncpa [#allocation8], 0 }
   0x3   :  { %20 = vsyncpa [#allocation11], 0  ;;  %s775_s21 = smov [#allocation4]   ;;  %s635_s25 = scalar_lea.hbm %s989_s2, 128 }
   0x4   :  { %s39_s22 = sshll.u32 %s775_s21, 4  ;;  %p636_p0 = scmp.ne.s32.totalorder %s989_s2, %s635_s25  ;;  %s40_s22 = int_to_ptr.vmem [resolvable:$true] %s39_s22 }
   0x5   :  { %p639_p1 = scmp.lt.u32.totalorder %s635_s25, %s989_s2 }
   0x7   :  { %p641_p2 = pnand %p639_p1, %p636_p0 }
   0x9   :  { %644 = shalt.err (!%p641_p2)
}
   0xa   :  { %s645_s30 = scalar_lea.vmem %s40_s22, 128  ;;  %p650_p4 = scmp.lt.s32.totalorder %s40_s22, %s40_s22 }
   0xb   :  { %p646_p3 = scmp.ne.s32.totalorder %s40_s22, %s645_s30  ;;  %p651_p5 = scmp.lt.s32.totalorder %s645_s30, %s645_s30 }
   0xd   :  { %p652_p6 = por %p651_p5, %p650_p4 }
   0xf   :  { %p653_p7 = pnand %p652_p6, %p646_p3 }
  0x11   :  { %656 = shalt.err (!%p653_p7)
}
  0x12   :  { %42 = dma.hbm_to_vmem [thread:$0]  %s989_s2, 128, %s40_s22, [#allocation5]  }
  0x13   :  { %s776_s15 = smov [#allocation7]   ;;  %s777_s17 = smov [#allocation2]  }
  0x14   :  { %s68_s16 = sshll.u32 %s776_s15, 4  ;;  %s27_s18 = sshll.u32 %s777_s17, 4  ;;  %s69_s16 = int_to_ptr.vmem [resolvable:$true] %s68_s16  ;;  %s28_s18 = int_to_ptr.vmem [resolvable:$true] %s27_s18 }
  0x15   :  { %s657_s21 = scalar_lea.hbm %s995_s8, 256 }
  0x16   :  { %p658_p8 = scmp.ne.s32.totalorder %s995_s8, %s657_s21  ;;  %p661_p9 = scmp.lt.u32.totalorder %s657_s21, %s995_s8 }
  0x18   :  { %p663_p10 = pnand %p661_p9, %p658_p8 }
  0x1a   :  { %666 = shalt.err (!%p663_p10)
}
  0x1b   :  { %s667_s2 = scalar_lea.vmem %s69_s16, 256  ;;  %p672_p12 = scmp.lt.s32.totalorder %s69_s16, %s69_s16 }
  0x1c   :  { %p668_p11 = scmp.ne.s32.totalorder %s69_s16, %s667_s2  ;;  %p673_p13 = scmp.lt.s32.totalorder %s667_s2, %s667_s2 }
  0x1e   :  { %p674_p0 = por %p673_p13, %p672_p12 }
  0x20   :  { %p675_p1 = pnand %p674_p0, %p668_p11 }
  0x22   :  { %678 = shalt.err (!%p675_p1)
}
  0x23   :  { %s778_s22 = smov 128   ;;  %s779_s27 = smov 8  }
  0x24   :  { %74 = dma.hbm_to_vmem [thread:$0]  %s995_s8, 256, %s69_s16, [#allocation8], %s778_s22, %s778_s22, %s779_s27  }
  0x25   :  { %s679_s14 = scalar_lea.hbm %s987_s0, 128 }
  0x26   :  { %p680_p2 = scmp.ne.s32.totalorder %s987_s0, %s679_s14  ;;  %p683_p3 = scmp.lt.u32.totalorder %s679_s14, %s987_s0 }
  0x28   :  { %p685_p4 = pnand %p683_p3, %p680_p2 }
  0x2a   :  { %688 = shalt.err (!%p685_p4)
}
  0x2b   :  { %s689_s21 = scalar_lea.vmem %s28_s18, 128  ;;  %p694_p6 = scmp.lt.s32.totalorder %s28_s18, %s28_s18 }
  0x2c   :  { %p690_p5 = scmp.ne.s32.totalorder %s28_s18, %s689_s21  ;;  %p695_p7 = scmp.lt.s32.totalorder %s689_s21, %s689_s21 }
  0x2e   :  { %p696_p8 = por %p695_p7, %p694_p6 }
  0x30   :  { %p697_p9 = pnand %p696_p8, %p690_p5 }
  0x32   :  { %700 = shalt.err (!%p697_p9)
}
  0x33   :  { %30 = dma.hbm_to_vmem [thread:$0]  %s987_s0, 128, %s28_s18, [#allocation3]  }
  0x34   :  { %s780_s23 = smov [#allocation6]   ;;  %s781_s25 = smov [#allocation9]  }
  0x35   :  { %s48_s24 = sshll.u32 %s780_s23, 4  ;;  %s81_s26 = sshll.u32 %s781_s25, 4  ;;  %s49_s24 = int_to_ptr.vmem [resolvable:$true] %s48_s24  ;;  %s82_s26 = int_to_ptr.vmem [resolvable:$true] %s81_s26 }
  0x36   :  { %s701_s29 = scalar_lea.hbm %s990_s3, 384 }
  0x37   :  { %p702_p10 = scmp.ne.s32.totalorder %s990_s3, %s701_s29  ;;  %p705_p11 = scmp.lt.u32.totalorder %s701_s29, %s990_s3 }
  0x39   :  { %p707_p12 = pnand %p705_p11, %p702_p10 }
  0x3b   :  { %710 = shalt.err (!%p707_p12)
}
  0x3c   :  { %s711_s0 = scalar_lea.vmem %s49_s24, 384  ;;  %p716_p0 = scmp.lt.s32.totalorder %s49_s24, %s49_s24 }
  0x3d   :  { %p712_p13 = scmp.ne.s32.totalorder %s49_s24, %s711_s0  ;;  %p717_p1 = scmp.lt.s32.totalorder %s711_s0, %s711_s0 }
  0x3f   :  { %p718_p2 = por %p717_p1, %p716_p0 }
  0x41   :  { %p719_p3 = pnand %p718_p2, %p712_p13 }
  0x43   :  { %722 = shalt.err (!%p719_p3)
}
  0x44   :  { %54 = dma.hbm_to_vmem [thread:$0]  %s990_s3, 384, %s49_s24, [#allocation5], %s778_s22, %s778_s22, %s779_s27  }
  0x45   :  { %s723_s21 = scalar_lea.hbm %s996_s9, 16 }
  0x46   :  { %p724_p4 = scmp.ne.s32.totalorder %s996_s9, %s723_s21  ;;  %p727_p5 = scmp.lt.u32.totalorder %s723_s21, %s996_s9 }
  0x48   :  { %p729_p6 = pnand %p727_p5, %p724_p4 }
  0x4a   :  { %732 = shalt.err (!%p729_p6)
}
  0x4b   :  { %s733_s2 = scalar_lea.vmem %s82_s26, 16  ;;  %s737_s28 = scalar_lea.vmem %s82_s26, 32 }
  0x4c   :  { %p734_p7 = scmp.ne.s32.totalorder %s82_s26, %s733_s2  ;;  %p738_p8 = scmp.lt.s32.totalorder %s82_s26, %s82_s26 }
  0x4d   :  { %p739_p9 = scmp.lt.s32.totalorder %s737_s28, %s733_s2 }
  0x4f   :  { %p740_p10 = por %p739_p9, %p738_p8 }
  0x51   :  { %p741_p11 = pnand %p740_p10, %p734_p7 }
  0x53   :  { %744 = shalt.err (!%p741_p11)
}
  0x54   :  { %84 = dma.hbm_to_vmem [thread:$0]  %s996_s9, 16, %s82_s26, [#allocation8]  }
  0x55   :  { %s782_s27 = smov [#allocation10]   ;;  %s745_s13 = scalar_lea.hbm %s998_s11, 16 }
  0x56   :  { %s93_s24 = sshll.u32 %s782_s27, 4  ;;  %p746_p12 = scmp.ne.s32.totalorder %s998_s11, %s745_s13  ;;  %s94_s24 = int_to_ptr.vmem [resolvable:$true] %s93_s24 }
  0x57   :  { %p749_p13 = scmp.lt.u32.totalorder %s745_s13, %s998_s11 }
  0x59   :  { %p751_p0 = pnand %p749_p13, %p746_p12 }
  0x5b   :  { %754 = shalt.err (!%p751_p0)
}
  0x5c   :  { %s755_s17 = scalar_lea.vmem %s94_s24, 16  ;;  %s759_s9 = scalar_lea.vmem %s94_s24, 32 }
  0x5d   :  { %p756_p1 = scmp.ne.s32.totalorder %s94_s24, %s755_s17  ;;  %p760_p2 = scmp.lt.s32.totalorder %s94_s24, %s94_s24 }
  0x5e   :  { %p761_p3 = scmp.lt.s32.totalorder %s759_s9, %s755_s17 }
  0x60   :  { %p762_p4 = por %p761_p3, %p760_p2 }
  0x62   :  { %p763_p5 = pnand %p762_p4, %p756_p1 }
  0x64   :  { %766 = shalt.err (!%p763_p5)
}
  0x65   :  { %96 = dma.hbm_to_vmem [thread:$0]  %s998_s11, 16, %s94_s24, [#allocation11]  }
  0x66   :  { %767 = dma.done.wait [#allocation3], 128  }
  0x67   :  { %768 = vsyncadd [#allocation3], 4294967168 }
  0x68   :  { %769 = dma.done.wait [#allocation5], 512  }
  0x69   :  { %770 = vsyncadd [#allocation5], 4294966784 }
  0x6a   :  { %771 = dma.done.wait [#allocation8], 272  }
  0x6b   :  { %772 = vsyncadd [#allocation8], 4294967024 }
  0x6c   :  { %773 = dma.done.wait [#allocation11], 16  }
  0x6d   :  { %774 = vsyncadd [#allocation11], 4294967280  ;;  %v783_v0 = vmov 0.0|0.0   ;;  %vm784_vm0 = vmmov 0   ;;  %v785_v1 = vmov 0.0   ;;  %v116_v2 = vld [vmem:[#allocation6] sm:$0xff] }
  0x6e   :  { %593 = vmatprep.subr.bf16.mxu0 %v783_v0  ;;  %561 = vmatprep.mubr.msk.f32.mxu0 %vm784_vm0, %v785_v1  ;;  %v117_v3 = vld [vmem:[#allocation6 + $0x8] sm:$0xff]  ;;  %v118_v5 = vld [vmem:[#allocation6 + $0x10] sm:$0xff]  ;;  %vm126_vm1 = vcmask 195584   ;;  %v402_v8 = vld [vmem:[%s997_s10 + $0x8] sm:$0xff]  ;;  %vm200_vm2 = vcmask 261120   ;;  %vm246_vm3 = vcmask 1040384  }
  0x6f   :  { %596 = vmatprep.subr.bf16.mxu1 %v783_v0  ;;  %568 = vmatprep.mubr.msk.f32.mxu1 %vm784_vm0, %v785_v1  ;;  %v594_v4 = vpack.c.bf16 %v117_v3, %v116_v2  ;;  %v115_v6 = vld [vmem:[#allocation2] sm:$0xff]  ;;  %v403_v9 = vld [vmem:[%s997_s10 + $0x10] sm:$0xff]  ;;  %v404_v11 = vld [vmem:[%s997_s10 + $0x18] sm:$0xff]  ;;  %vm786_vm4 = vmmov 1   ;;  %vm242_vm6 = vcmask 72704  }
  0x70   :  { %v401_v7 = vld [vmem:[%s997_s10] sm:$0xff]  ;;  %v610_v12 = vpack.c.bf16 %v404_v11, %v403_v9  ;;  %v948_v13 = vld [vmem:[#allocation4] sm:$0xff]  ;;  %v241_v22 = vld [vmem:[#allocation7 + $0x8] sm:$0x1] }
  0x71   :  { %595 = vmatpush3.bf16.msra.mxu0 %v594_v4  ;;  %v607_v10 = vpack.c.bf16 %v402_v8, %v401_v7  ;;  %v527_v14 = vld [vmem:[%s991_s4] ss:$0 sm:$0xff]  ;;  %v240_v21 = vld [vmem:[#allocation7] sm:$0xff]  ;;  %vm598_vm5 = vmpackc.low %vm246_vm3, %vm786_vm4 }
  0x72   :  { %559 = vmatprep.subr.mxu0 %v785_v1  ;;  %v597_v23 = vpack.c.bf16 %v241_v22, %v240_v21  ;;  %v236_v24 = vld [vmem:[%s994_s7] sm:$0xff]  ;;  %v237_v25 = vld [vmem:[%s994_s7 + $0x8] sm:$0xff]  ;;  %v238_v28 = vld [vmem:[%s994_s7 + $0x10] sm:$0xff] }
  0x73   :  { %v235_v26 = vld [vmem:[%s988_s1] sm:$0xff]  ;;  %v601_v27 = vpack.c.bf16 %v237_v25, %v236_v24  ;;  %v239_v29 = vld [vmem:[%s994_s7 + $0x18] sm:$0xff]  ;;  %s787_s1 = smov 64  }
  0x74   :  { %599 = vmatpush3.bf16.msk.msra.mxu1 %vm598_vm5, %v597_v23  ;;  %v604_v30 = vpack.c.bf16 %v239_v29, %v238_v28  ;;  %v535_v31 = vld [vmem:[#allocation10] ss:$0 sm:$0xff]  ;;  %v529_v44 = vld [vmem:[%s992_s5] ss:$0 sm:$0xff]  ;;  %v534_v53 = vld [vmem:[#allocation9] ss:$0 sm:$0xff] }
  0x75   :  { %560 = vmatpush3.msra.mxu0 %v118_v5  ;;  %600 = vmatprep.subr.bf16.mxu1 %v783_v0  ;;  %v530_v46 = vld [vmem:[%s993_s6] ss:$0 sm:$0xff]  ;;  %s788_s5 = smov 32   ;;  %s789_s6 = smov 96  }
  0x76   :  { %562 = vmatmul.mubr.msk.f32.vlgmr.msra.gmra.mrb[0].mxu0 %vm126_vm1, %v115_v6  ;;  %606 = vmatprep.subr.bf16.mxu0 %v783_v0 }
  0x77   :  { %590 = vmatprep.mubr.msk.f32.mxu0 %vm784_vm0, %v785_v1  ;;  %608 = vmatpush3.bf16.msra.mxu0 %v607_v10 }
  0x78   :  { %609 = vmatprep.subr.bf16.mxu0 %v783_v0  ;;  %569 = vmatmul.mubr.msk.f32.vlgmr.msra.gmra.mrb[0].mxu1 %vm242_vm6, %v235_v26 }
  0x79   :  { %602 = vmatpush3.bf16.msra.mxu1 %v601_v27  ;;  %579 = vmatprep.mubr.msk.f32.mxu1 %vm784_vm0, %v785_v1 }
  0x7a   :  { %603 = vmatprep.subr.bf16.mxu1 %v783_v0 }
  0x7b   :  { %611 = vmatpush3.bf16.msra.mxu0 %v610_v12 }
  0x7d   :  { %605 = vmatpush3.bf16.msra.mxu1 %v604_v30 }
  0x7e   :  { %591 = vmatmul.mubr.msk.f32.vlgmr.msra.gmra.mrb[2].mxu0 %vm200_vm2, %v948_v13 }
 0x149   :  { %v196_v15 = vpop.f32.mrb[0].mxu0 }
 0x14a   :  { %v197_v16 = vadd.f32 %v527_v14, %v196_v15  ;;  %v563_v17 = vpop.f32.mrb[1].mxu0 }
 0x14b   :  { %v316_v50 = vpop.f32.mrb[0].mxu1 }
 0x14c   :  { %v201_v18 = vsel %vm200_vm2, %v197_v16, 0.0  ;;  %v206_v19 = vmul.f32 %v197_v16, %v197_v16  ;;  %v570_v51 = vpop.f32.mrb[1].mxu1 }
 0x14d   :  { %202 = vadd.xlane.f32.xlu0 %v201_v18 }
 0x14e   :  { %v207_v20 = vsel %vm200_vm2, %v206_v19, 0.0 }
 0x151   :  { %208 = vadd.xlane.f32.xlu0 %v207_v20  ;;  %v481_v32 = vpop.f32.mrb[2].mxu0 }
 0x152   :  { %v482_v33 = vadd.f32 %v535_v31, %v481_v32  ;;  %v592_v34 = vpop.f32.mrb[3].mxu0 }
 0x154   :  { %493 = vrot.lane.b32.xlu1 %v482_v33, %s787_s1 }
 0x1c6   :  { %v494_v61 = vpop.permute.xlu1 %493 }
 0x1da   :  { %v203_v35 = vpop.xlane.xlu0 %202 }
 0x1db   :  { %v205_v36 = vmul.f32 0.03125, %v203_v35 }
 0x1dd   :  { %v211_v38 = vmul.f32 %v205_v36, %v205_v36  ;;  %v213_v42 = vsub.f32 %v197_v16, %v205_v36 }
 0x1de   :  { %v209_v37 = vpop.xlane.xlu0 %208 }
 0x1df   :  { %v210_v39 = vmul.f32 0.03125, %v209_v37 }
 0x1e1   :  { %v212_v40 = vsub.f32 %v210_v39, %v211_v38 }
 0x1e3   :  { %v214_v41 = vadd.f32 1e-05, %v212_v40 }
 0x1e5   :  { %627 = vrsqrt.f32 %v214_v41 }
 0x1ef   :  { %v628_v43 = vpop.eup %627 }
 0x1f0   :  { %v216_v45 = vmul.f32 %v628_v43, %v213_v42 }
 0x1f2   :  { %v224_v47 = vmul.f32 %v529_v44, %v216_v45 }
 0x1f4   :  { %v232_v48 = vadd.f32 %v530_v46, %v224_v47 }
 0x1f6   :  { %v233_v49 = vmax.f32 %v232_v48, 0.0 }
 0x1f8   :  { %580 = vmatmul.mubr.msk.f32.vlgmr.msra.gmra.mrb[2].mxu1 %vm200_vm2, %v233_v49 }
 0x2cb   :  { %v389_v52 = vpop.f32.mrb[2].mxu1 }
 0x2cc   :  { %v390_v54 = vadd.f32 %v389_v52, %v316_v50  ;;  %v581_v55 = vpop.f32.mrb[3].mxu1 }
 0x2ce   :  { %v400_v56 = vadd.f32 %v534_v53, %v390_v54 }
 0x2d0   :  { %v485_v57 = vadd.f32 %v482_v33, %v400_v56 }
 0x2d2   :  { %v537_v58 = vmul.f32 -1.442695, %v485_v57 }
 0x2d4   :  { %629 = vpow2.f32 %v537_v58 }
 0x2de   :  { %v630_v59 = vpop.eup %629 }
 0x2df   :  { %v489_v60 = vadd.f32 1.0, %v630_v59 }
 0x2e1   :  { %631 = vrcp.f32 %v489_v60 }
 0x2eb   :  { %v632_v62 = vpop.eup %631 }
 0x2ec   :  { %v496_v63 = vmul.f32 %v632_v62, %v494_v61  ;;  %v503_v4 = vsub.f32 1.0, %v632_v62 }
 0x2ee   :  { %498 = vrot.lane.b32.xlu1 %v496_v63, %s787_s1 }
 0x2f2   :  { %509 = vrot.lane.b32.xlu1 %v948_v13, %s788_s5 }
 0x360   :  { %v499_v0 = vpop.permute.xlu1 %498 }
 0x361   :  { %v501_v1 = vadd.f32 %v499_v0, %v400_v56 }
 0x363   :  { %633 = vtanh.f32 %v501_v1 }
 0x364   :  { %v510_v3 = vpop.permute.xlu1 %509 }
 0x365   :  { %v512_v6 = vmul.f32 %v632_v62, %v510_v3 }
 0x36d   :  { %v634_v2 = vpop.eup %633 }
 0x36e   :  { %505 = vrot.lane.b32.xlu0 %v634_v2, %s789_s6 }
 0x3e0   :  { %v506_v5 = vpop.permute.xlu0 %505 }
 0x3e1   :  { %v508_v7 = vmul.f32 %v506_v5, %v503_v4 }
 0x3e3   :  { %v513_v8 = vadd.f32 %v512_v6, %v508_v7 }
 0x3e5   :  { %515 = vrot.lane.b32.xlu1 %v513_v8, %s789_s6 }
 0x457   :  { %v516_v9 = vpop.permute.xlu1 %515 }
 0x458   :  { %518 = vst.msk [vmem:[%s999_s12] sm:$0xff] %vm200_vm2, %v516_v9 }
 0x459   :  { %523 = vsyncpa [#allocation3], 1 }
 0x45a   :  { %524 = vsyncpa [#allocation5], 1 }
 0x45b   :  { %525 = vsyncpa [#allocation8], 1 }
 0x45c   :  { %526 = vsyncpa [#allocation11], 1 }

</bundles_post_ra>
